<compile_context>
chip_gen: v7x
topology: tpu7x:2x2x1
jax: 0.10.0
libtpu: 0.0.40
codegen_flags: <defaults>
</compile_context>

<pallas_src>
import jax
import jax.numpy as jnp
from jax.experimental import pallas as pl
from jax.experimental.pallas import tpu as pltpu
import numpy as np

# ---- irreps configuration (synthetic, deterministic) -----------------------
MUL  = 8                      # multiplicity of every irrep ("8x0e + 8x1o + 8x2e + 8x3o")
LMAX = 3                      # num_spherical = LMAX + 1
D    = MUL * (LMAX + 1) ** 2  # 8 * 16 = 128 irrep channels
N    = 64                     # number of rows (points / nodes)

# Max row tile: 4096 rows * 128 cols * 4 B = 2 MiB per block.  In + out
# double-buffers plus in-kernel temporaries ~= 12-13 MiB, budgeted below via
# vmem_limit_bytes=32 MiB (safe on v5e/v6e/v7x; v7x physical ceiling is 64 MiB).
MAX_TN = 4096


# ---- Pallas kernel ----------------------------------------------------------
def scalar_activation_kernel(x_ref, o_ref):
    x = x_ref[...]                                  # [TN, D]
    scalars = x[:, :MUL]                            # [TN, MUL]  (l=0 block)

    sig = jax.nn.sigmoid(scalars)                   # gates AND the silu factor

    # Build the fused one-hot "column -> owning multiplicity" matrix B in-kernel.
    # B[i, j] = 1 iff output column j belongs to multiplicity i (any l).
    # A handful of VPU ops on one (8,128) vreg per grid step; hidden under DMA.
    row = jax.lax.broadcasted_iota(jnp.int32, (MUL, D), 0)
    col = jax.lax.broadcasted_iota(jnp.int32, (MUL, D), 1)
    B = jnp.zeros((MUL, D), dtype=jnp.float32)
    for l in range(LMAX + 1):                       # static unroll (4 terms)
        off = MUL * l * l                           # start column of l-block
        dim = 2 * l + 1
        lo = off + row * dim
        B = B + ((col >= lo) & (col < lo + dim)).astype(jnp.float32)

    # One tiny K=8 MXU matmul broadcasts each sigmoid value to all columns it
    # owns.  For the l=0 columns the subsequent multiply by x yields
    # sigmoid(s)*s = silu(s) exactly; for l>=1 it is the gate product.
    # precision=HIGHEST: never demote the f32 sigmoids to bf16 (exactness).
    gate_full = jnp.dot(sig, B,
                        preferred_element_type=jnp.float32,
                        precision=jax.lax.Precision.HIGHEST)   # [TN, D]

    o_ref[...] = (gate_full * x).astype(o_ref.dtype)


def _pick_tn(n):
    """Row tile: (a) legal ((8,128)-divisible or full array), (b) <= MAX_TN,
    (c) >= 2 grid steps when possible so v7x's two TensorCores both get work."""
    if n <= MAX_TN:
        if n >= 16 and n % 16 == 0:
            return n // 2          # two steps, each a multiple of 8 rows
        return n                   # single full block (always legal)
    # n > MAX_TN: largest multiple of 8 <= MAX_TN that divides n exactly
    for t in range(MAX_TN, 7, -8):
        if n % t == 0:
            return t
    return MAX_TN                  # no exact divisor: wrapper pads rows


def scalar_activation(features, *, tn=None):
    """features: [N, D] float32 -> [N, D] float32."""
    n, d = features.shape
    assert d == D, f"expected last dim {D}, got {d}"
    if tn is None:
        tn = _pick_tn(n)

    # Ragged row counts: pad to a tile multiple, compute, slice back.
    n_pad = pl.cdiv(n, tn) * tn
    x = features if n_pad == n else jnp.pad(features, ((0, n_pad - n), (0, 0)))

    cost = pl.CostEstimate(
        flops=2 * n_pad * MUL * D,        # K=8 matmul + elementwise mul
        transcendentals=n_pad * MUL,      # sigmoid on the l=0 block
        bytes_accessed=2 * n_pad * D * 4, # one read + one write of [N, D] f32
    )

    out = pl.pallas_call(
        scalar_activation_kernel,
        out_shape=jax.ShapeDtypeStruct((n_pad, d), features.dtype),
        grid=(n_pad // tn,),
        in_specs=[pl.BlockSpec((tn, D), lambda i: (i, 0))],
        out_specs=pl.BlockSpec((tn, D), lambda i: (i, 0)),
        compiler_params=pltpu.CompilerParams(
            dimension_semantics=("parallel",),
            vmem_limit_bytes=32 << 20),
        cost_estimate=cost,
    )(x)
    return out if n_pad == n else out[:n]


# ---- pure-JAX reference (mirrors the PyTorch forward) ----------------------
def scalar_activation_ref(x):
    scalars = x[:, :MUL]
    parts = [jax.nn.silu(scalars)]                  # act_scalars(scalars)
    gates = jax.nn.sigmoid(scalars)                 # act_gates(scalars.repeat(...))
    for l in range(1, LMAX + 1):
        off = MUL * l * l
        dim = 2 * l + 1
        blk = x[:, off:off + MUL * dim].reshape(-1, MUL, dim)
        parts.append((gates[:, :, None] * blk).reshape(-1, MUL * dim))
    return jnp.concatenate(parts, axis=-1)


if __name__ == "__main__":
    key = jax.random.PRNGKey(0)
    features = jax.random.normal(key, (N, D), dtype=jnp.float32)

    out = scalar_activation(features)
    out = jax.block_until_ready(out)

    ref = scalar_activation_ref(features)
    np.testing.assert_allclose(np.asarray(out), np.asarray(ref),
                               rtol=1e-5, atol=1e-5)
    print("KERNEL_OK")
</pallas_src>

<mosaic_0001>
module attributes {stable_mosaic.version = 11 : i64} {
  func.func @scalar_activation_kernel(%arg0: i32, %arg1: memref<32x128xf32, #tpu.memory_space<vmem>>, %arg2: memref<32x128xf32, #tpu.memory_space<vmem>>) attributes {dimension_semantics = [#tpu.dimension_semantics<parallel>], iteration_bounds = array<i64: 2>, scalar_prefetch = 0 : i64, scratch_operands = 0 : i64, tpu.core_type = #tpu.core_type<tc>, window_params = [{transform_indices = @transform_0, window_bounds = array<i64: 32, 128>}, {transform_indices = @transform_1, window_bounds = array<i64: 32, 128>}]} {
    %c0 = arith.constant 0 : index
    %c0_0 = arith.constant 0 : index
    %0 = vector.load %arg1[%c0, %c0_0] : memref<32x128xf32, #tpu.memory_space<vmem>>, vector<32x128xf32>
    %1 = vector.extract_strided_slice %0 {offsets = [0, 0], sizes = [32, 8], strides = [1, 1]} : vector<32x128xf32> to vector<32x8xf32>
    %2 = arith.negf %1 : vector<32x8xf32>
    %3 = math.exp %2 : vector<32x8xf32>
    %cst = arith.constant 1.000000e+00 : f32
    %4 = vector.broadcast %cst : f32 to vector<32x8xf32>
    %5 = arith.addf %4, %3 : vector<32x8xf32>
    %6 = arith.divf %4, %5 : vector<32x8xf32>
    %7 = tpu.iota {dimensions = array<i32: 0>} : vector<8x128xi32>
    %8 = tpu.iota {dimensions = array<i32: 1>} : vector<8x128xi32>
    %cst_1 = arith.constant 0.000000e+00 : f32
    %9 = vector.broadcast %cst_1 : f32 to vector<8x128xf32>
    %c1_i32 = arith.constant 1 : i32
    %10 = vector.broadcast %c1_i32 : i32 to vector<8x128xi32>
    %11 = arith.muli %7, %10 : vector<8x128xi32>
    %c0_i32 = arith.constant 0 : i32
    %12 = vector.broadcast %c0_i32 : i32 to vector<8x128xi32>
    %13 = arith.addi %12, %11 : vector<8x128xi32>
    %14 = arith.cmpi sge, %8, %13 : vector<8x128xi32>
    %c1_i32_2 = arith.constant 1 : i32
    %15 = vector.broadcast %c1_i32_2 : i32 to vector<8x128xi32>
    %16 = arith.addi %13, %15 : vector<8x128xi32>
    %17 = arith.cmpi slt, %8, %16 : vector<8x128xi32>
    %18 = arith.andi %14, %17 : vector<8x128xi1>
    %19 = arith.extui %18 : vector<8x128xi1> to vector<8x128xi32>
    %20 = arith.sitofp %19 : vector<8x128xi32> to vector<8x128xf32>
    %21 = arith.addf %9, %20 : vector<8x128xf32>
    %c3_i32 = arith.constant 3 : i32
    %22 = vector.broadcast %c3_i32 : i32 to vector<8x128xi32>
    %23 = arith.muli %7, %22 : vector<8x128xi32>
    %c8_i32 = arith.constant 8 : i32
    %24 = vector.broadcast %c8_i32 : i32 to vector<8x128xi32>
    %25 = arith.addi %24, %23 : vector<8x128xi32>
    %26 = arith.cmpi sge, %8, %25 : vector<8x128xi32>
    %c3_i32_3 = arith.constant 3 : i32
    %27 = vector.broadcast %c3_i32_3 : i32 to vector<8x128xi32>
    %28 = arith.addi %25, %27 : vector<8x128xi32>
    %29 = arith.cmpi slt, %8, %28 : vector<8x128xi32>
    %30 = arith.andi %26, %29 : vector<8x128xi1>
    %31 = arith.extui %30 : vector<8x128xi1> to vector<8x128xi32>
    %32 = arith.sitofp %31 : vector<8x128xi32> to vector<8x128xf32>
    %33 = arith.addf %21, %32 : vector<8x128xf32>
    %c5_i32 = arith.constant 5 : i32
    %34 = vector.broadcast %c5_i32 : i32 to vector<8x128xi32>
    %35 = arith.muli %7, %34 : vector<8x128xi32>
    %c32_i32 = arith.constant 32 : i32
    %36 = vector.broadcast %c32_i32 : i32 to vector<8x128xi32>
    %37 = arith.addi %36, %35 : vector<8x128xi32>
    %38 = arith.cmpi sge, %8, %37 : vector<8x128xi32>
    %c5_i32_4 = arith.constant 5 : i32
    %39 = vector.broadcast %c5_i32_4 : i32 to vector<8x128xi32>
    %40 = arith.addi %37, %39 : vector<8x128xi32>
    %41 = arith.cmpi slt, %8, %40 : vector<8x128xi32>
    %42 = arith.andi %38, %41 : vector<8x128xi1>
    %43 = arith.extui %42 : vector<8x128xi1> to vector<8x128xi32>
    %44 = arith.sitofp %43 : vector<8x128xi32> to vector<8x128xf32>
    %45 = arith.addf %33, %44 : vector<8x128xf32>
    %c7_i32 = arith.constant 7 : i32
    %46 = vector.broadcast %c7_i32 : i32 to vector<8x128xi32>
    %47 = arith.muli %7, %46 : vector<8x128xi32>
    %c72_i32 = arith.constant 72 : i32
    %48 = vector.broadcast %c72_i32 : i32 to vector<8x128xi32>
    %49 = arith.addi %48, %47 : vector<8x128xi32>
    %50 = arith.cmpi sge, %8, %49 : vector<8x128xi32>
    %c7_i32_5 = arith.constant 7 : i32
    %51 = vector.broadcast %c7_i32_5 : i32 to vector<8x128xi32>
    %52 = arith.addi %49, %51 : vector<8x128xi32>
    %53 = arith.cmpi slt, %8, %52 : vector<8x128xi32>
    %54 = arith.andi %50, %53 : vector<8x128xi1>
    %55 = arith.extui %54 : vector<8x128xi1> to vector<8x128xi32>
    %56 = arith.sitofp %55 : vector<8x128xi32> to vector<8x128xf32>
    %57 = arith.addf %45, %56 : vector<8x128xf32>
    %cst_6 = arith.constant dense<0.000000e+00> : vector<32x128xf32>
    %58 = tpu.matmul %6, %57, %cst_6 {dimension_numbers = #tpu.dot_dimension_numbers<[1], [0], [0], [1], [0, 0, 1, 1], [], []>, precision = #tpu.contract_precision<fp32>} : vector<32x8xf32>, vector<8x128xf32>, vector<32x128xf32> -> vector<32x128xf32>
    %59 = arith.mulf %58, %0 : vector<32x128xf32>
    %c0_7 = arith.constant 0 : index
    %c0_8 = arith.constant 0 : index
    %60 = vector.load %arg2[%c0_7, %c0_8] : memref<32x128xf32, #tpu.memory_space<vmem>>, vector<32x128xf32>
    tpu.vector_store %arg2[%c0_7, %c0_8], %59 {strides = array<i32>} : memref<32x128xf32, #tpu.memory_space<vmem>>, vector<32x128xf32>,
    return
  }
  func.func @transform_0(%arg0: i32) -> (i32, i32) {
    %c0_i32 = arith.constant 0 : i32
    %c0_i32_0 = arith.constant 0 : i32
    return %arg0, %c0_i32 : i32, i32
  }
  func.func @transform_1(%arg0: i32) -> (i32, i32) {
    %c0_i32 = arith.constant 0 : i32
    %c0_i32_0 = arith.constant 0 : i32
    return %arg0, %c0_i32 : i32, i32
  }
}

</mosaic_0001>

<bundles_post_ra>
// kernel: tpu_custom_call.1
= control target key start
LH: loop header
LB: loop body
LE: loop exit
PB: predicated region body
PF: predicated region fallthrough
CT: control target
= control target key end

     0   :  { %6 = vsyncpa [#allocation3], 0  ;;  %s1389_s0 = inlined_call_operand.hbm [shape: f32[64,128], index: 0, kind: input, shape index: {}]   ;;  %s1390_s1 = inlined_call_operand.hbm [shape: f32[64,128], index: 1, kind: output, shape index: {}]  }
   0x1   :  { %8 = vsyncpa [#allocation3 + $0x1], 0 }
   0x2   :  { %9 = vsyncpa [#allocation4], 0 }
   0x3   :  { %11 = vsyncpa [#allocation4 + $0x1], 0  ;;  %s1190_s6 = smov 0   ;;  %s1192_s7 = smov 0  }
   0x4   :  { %s1194_s8 = smov 0   ;;  %s1196_s9 = smov 0  }
   0x5 LB: > { %s1211_s10 = sadd.s32 4294967295, %s1171_s9   ;;  %s886_s11 = sadd.s32 4294967294, %s1171_s9   ;;  %s1171_s9 = sphi %s1196_s9, %s1403_s9   ;;  %s1167_s8 = sphi %s1194_s8, %s1402_s8   ;;  %s1163_s7 = sphi %s1192_s7, %s1401_s7   ;;  %s1159_s6 = sphi %s1190_s6, %s1400_s6  }
   0x6   : > { %s1215_s12 = sadd.s32 1, %s1171_s9   ;;  %s24_s13 = sadd.s32 1, %s1167_s8 }
   0x7   : > { %s21_s14 = ssub.s32 %s1171_s9, %s1215_s12  ;;  %p31_p0 = scmp.ne.s32.totalorder %s1167_s8, %s1163_s7 }
   0x8   : > { %p22_p1 = scmp.eq.s32.totalorder %s21_s14, 0  ;;  %p32_p2 = scmp.eq.s32.totalorder %s1171_s9, 0 }
   0x9   : > { %p37_p3 = scmp.ne.s32.totalorder %s1163_s7, %s1159_s6  ;;  %p38_p4 = scmp.eq.s32.totalorder %s1211_s10, 0 }
   0xa   : > { %s1227_s15 = scalar_select %p22_p1, %s1167_s8, %s24_s13  }
   0xb   : > { %p1229_p5 = por %p32_p2, %p31_p0  ;;  %p1233_p6 = por %p38_p4, %p37_p3 }
   0xc   : > { %p61_p7 = scmp.eq.s32.totalorder %s1211_s10, 1  ;;  %p67_p8 = scmp.eq.s32.totalorder %s886_s11, 1 }
   0xd   : > { %p1020_p10 = scmp.lt.s32.totalorder %s1171_s9, 2  ;;  %s87_s20 = sand.u32 1, %s1167_s8  }
   0xe   : > { %p1240_p11 = por %p61_p7, %p31_p0  ;;  %p1244_p12 = por %p67_p8, %p37_p3 }
   0xf   : > { %s908_s21 = sshll.u32 %s1171_s9, 9  ;;  %s889_s22 = sshll.u32 %s87_s20, 5 }
  0x10   : > { %s1394_s18 = scalar_select %p1240_p11, 1, 0 }
  0x11   : > { %s1395_s19 = scalar_select %p1244_p12, 1, 0 }
  0x12   : > { %s1253_s25 = scalar_lea.hbm %s1389_s0, %s908_s21  ;;  %s91_s26 = scalar_lea.vmem [#allocation2], %s889_s22 }
  0x13   : > { %s98_s27 = sshll.u32 %s91_s26, 4  ;;  %p1257_p13 = pnand %p1020_p10, %p1229_p5  ;;  %s1261_s27 = int_to_ptr.vmem [resolvable:$true] %s98_s27 }
  0x14   : > { %s1263_s29 = scalar_lea.sflag [#allocation3], %s87_s20  ;;  %s1075_s30 = scalar_lea.hbm %s1253_s25, 512 }
  0x15   : > { %p1076_p0 = scmp.ne.s32.totalorder %s1253_s25, %s1075_s30  ;;  %p1077_p1 = pneg %p1257_p13 }
  0x16   : > { %s1080_s4 = scalar_lea.hbm %s1389_s0, 1024  ;;  %p1081_p4 = scmp.lt.u32.totalorder %s1253_s25, %s1389_s0 }
  0x17   : > { %p1078_p2 = pnand %p1077_p1, %p1076_p0  ;;  %p1082_p5 = scmp.lt.u32.totalorder %s1080_s4, %s1075_s30 }
  0x18   : > { %p1084_p8 = scmp.lt.u32.totalorder %s1075_s30, %s1253_s25 }
  0x19   : > { %p1079_p3 = pneg %p1078_p2  ;;  %p1083_p7 = por %p1082_p5, %p1081_p4 }
  0x1b   : > { %p1085_p10 = por %p1084_p8, %p1083_p7 }
  0x1d   : > { %p1086_p9 = pnand %p1085_p10, %p1079_p3 }
  0x1f   : > { %1089 = shalt.err (!%p1086_p9)
}
  0x20   : > { %s1090_s13 = scalar_lea.vmem %s1261_s27, 512  ;;  %s1173_s14 = smov [#allocation2]  }
  0x21   : > { %p1091_p0 = scmp.ne.s32.totalorder %s1261_s27, %s1090_s13  ;;  %s1095_s16 = sshll.u32 %s1173_s14, 4  ;;  %s1096_s16 = int_to_ptr.vmem [resolvable:$false] %s1095_s16 }
  0x22   : > { %s1097_s20 = scalar_lea.vmem %s1096_s16, 1024  ;;  %p1098_p11 = scmp.lt.s32.totalorder %s1261_s27, %s1096_s16 }
  0x23   : > { %p1093_p2 = pnand %p1091_p0, %p1077_p1  ;;  %p1099_p4 = scmp.lt.s32.totalorder %s1097_s20, %s1090_s13 }
  0x25   : > { %p1094_p12 = pneg %p1093_p2  ;;  %p1100_p5 = por %p1099_p4, %p1098_p11 }
  0x27   : > { %p1101_p7 = pnand %p1100_p5, %p1094_p12 }
  0x29   : > { %1104 = shalt.err (!%p1101_p7)
}
  0x2a   : > { %s1174_s21 = smov 128   ;;  %s1175_s22 = smov 8  }
  0x2b   : > { %1015 = dma.hbm_to_vmem [thread:$0]  (!%p1257_p13), %s1253_s25, 512, %s1261_s27, %s1263_s29, %s1174_s21, %s1174_s21, %s1175_s22  }
  0x2c   : > { %p892_p9 = scmp.ge.s32.totalorder %s1171_s9, 1  ;;  %p106_p1 = scmp.lt.s32.totalorder %s1171_s9, 3 }
  0x2e   : > { %p107_p3 = pnand %p892_p9, %p106_p1 }
  0x2f   : > { %s1294_s23 = sand.u32 (!%p107_p3), 1, %s1163_s7  }
  0x30   : > { %110 = sbr.rel (%p107_p3) target bundleno = 348 (0x15c), region = 24  ;;  %s893_s24 = sshll.u32 (!%p107_p3), %s1294_s23, 5 }
  0x31   : > { %s113_s26 = scalar_lea.sflag (!%p107_p3), [#allocation3], %s1294_s23  ;;  %s116_s30 = scalar_lea.vmem (!%p107_p3), [#allocation2], %s893_s24 }
  0x37   : > { %1150 = dma.done.wait (%p1233_p6), %s113_s26, 512  }
  0x38   : > { %1152 = vsyncadd (%p1233_p6), %s113_s26, 4294966784  ;;  %v165_v0 = vlaneseq  ;;  %v1304_v10 = vld [vmem:[%s116_s30] sm:$0xff]  ;;  %v1306_v11 = vld [vmem:[%s116_s30 + $0x8] sm:$0xff]  ;;  %v1176_v12 = vmov 0.0   ;;  %vm203_vm12 = vcmask 64512   ;;  %s134_s17 = scalar_lea.vmem [#allocation5], %s893_s24 }
  0x39   : > { %v1308_v15 = vld [vmem:[%s116_s30 + $0x10] sm:$0xff]  ;;  %v1310_v16 = vld [vmem:[%s116_s30 + $0x18] sm:$0xff]  ;;  %v895_v19 = vmul.f32 -1.442695, %v1304_v10  ;;  %v896_v20 = vmul.f32 -1.442695, %v1306_v11 }
  0x3a   : > { %v166_v1 = vshrl.u32 %v165_v0, 7  ;;  %v168_v2 = vand.u32 127, %v165_v0  ;;  %v897_v21 = vmul.f32 -1.442695, %v1308_v15  ;;  %v898_v22 = vmul.f32 -1.442695, %v1310_v16 }
  0x3b   : > { %1059 = vpow2.f32 %v895_v19  ;;  %s813_s25 = sshll.u32 %s134_s17, 4  ;;  %s909_s27 = sshll.u32 %s1211_s10, 9  ;;  %s1338_s25 = int_to_ptr.vmem [resolvable:$true] %s813_s25 }
  0x3c   : > { %vm169_vm0 = vcmp.ge.s32.totalorder %v168_v2, %v166_v1  ;;  %v170_v3 = vadd.s32 1, %v166_v1  ;;  %v176_v4 = vmul.u32 3, %v166_v1  ;;  %v185_v5 = vmul.u32 5, %v166_v1  ;;  %s1344_s2 = scalar_lea.hbm %s1390_s1, %s909_s27  ;;  %s800_s10 = scalar_lea.sflag [#allocation4], %s1294_s23 }
  0x3d   : > { %v194_v6 = vmul.u32 7, %v166_v1  ;;  %1061 = vpow2.f32 %v896_v20  ;;  %s1105_s3 = scalar_lea.vmem %s1338_s25, 512  ;;  %p1397_p11 = scmp.ne.s32.totalorder %s1394_s18, 0 }
  0x3e   : > { %vm171_vm1 = vcmp.lt.s32.totalorder %v168_v2, %v170_v3  ;;  %v177_v7 = vadd.s32 8, %v176_v4  ;;  %v186_v8 = vadd.s32 32, %v185_v5  ;;  %1063 = vpow2.f32 %v897_v21  ;;  %p1106_p6 = scmp.ne.s32.totalorder %s1338_s25, %s1105_s3  ;;  %s1177_s4 = smov [#allocation5]  }
  0x3f   : > { %vm172_vm2 = vmand %vm169_vm0, %vm171_vm1  ;;  %v195_v9 = vadd.s32 72, %v194_v6  ;;  %1065 = vpow2.f32 %v898_v22  ;;  %s1109_s5 = sshll.u32 %s1177_s4, 4  ;;  %s1110_s5 = int_to_ptr.vmem [resolvable:$false] %s1109_s5 }
  0x40   : > { %v899_v13 = vsel %vm172_vm2, 1.0, %v1176_v12  ;;  %vm178_vm3 = vcmp.ge.s32.totalorder %v168_v2, %v177_v7  ;;  %v179_v14 = vadd.s32 3, %v177_v7  ;;  %vm187_vm4 = vcmp.ge.s32.totalorder %v168_v2, %v186_v8  ;;  %p1107_p12 = pnand %p1106_p6, %p1397_p11  ;;  %s1111_s11 = scalar_lea.vmem %s1110_s5, 1024 }
  0x41   : > { %v188_v17 = vadd.s32 5, %v186_v8  ;;  %vm196_vm5 = vcmp.ge.s32.totalorder %v168_v2, %v195_v9  ;;  %v197_v18 = vadd.s32 7, %v195_v9  ;;  %p1112_p8 = scmp.lt.s32.totalorder %s1338_s25, %s1110_s5  ;;  %p1113_p10 = scmp.lt.s32.totalorder %s1111_s11, %s1105_s3 }
  0x42   : > { %vm180_vm6 = vcmp.lt.s32.totalorder %v168_v2, %v179_v14  ;;  %p1108_p13 = pneg %p1107_p12 }
  0x43   : > { %vm181_vm7 = vmand %vm178_vm3, %vm180_vm6  ;;  %vm189_vm8 = vcmp.lt.s32.totalorder %v168_v2, %v188_v17  ;;  %vm198_vm9 = vcmp.lt.s32.totalorder %v168_v2, %v197_v18  ;;  %p1114_p0 = por %p1113_p10, %p1112_p8 }
  0x44   : > { %v900_v23 = vsel %vm181_vm7, 1.0, %v1176_v12  ;;  %vm190_vm10 = vmand %vm187_vm4, %vm189_vm8 }
  0x45   : > { %v184_v24 = vadd.f32 %v900_v23, %v899_v13  ;;  %v901_v25 = vsel %vm190_vm10, 1.0, %v1176_v12  ;;  %vm199_vm11 = vmand %vm196_vm5, %vm198_vm9  ;;  %v1060_v30 = vpop.eup %1059  ;;  %p1115_p2 = pnand %p1114_p0, %p1108_p13 }
  0x46   : > { %v902_v26 = vsel %vm199_vm11, 1.0, %v1176_v12  ;;  %v153_v33 = vadd.f32 1.0, %v1060_v30 }
  0x47   : > { %v193_v27 = vadd.f32 %v901_v25, %v184_v24  ;;  %v1062_v32 = vpop.eup %1061 }
  0x48   : > { %v1064_v34 = vpop.eup %1063  ;;  %v154_v35 = vadd.f32 1.0, %v1062_v32  ;;  %1067 = vrcp.f32 %v153_v33 }
  0x49   : > { %v202_v28 = vadd.f32 %v902_v26, %v193_v27  ;;  %v1066_v37 = vpop.eup %1065  ;;  %v155_v38 = vadd.f32 1.0, %v1064_v34 }
  0x4a   : > { %1069 = vrcp.f32 %v154_v35  ;;  %v156_v40 = vadd.f32 1.0, %v1066_v37 }
  0x4b   : > { %v1318_v29 = vand.u32 4294901760, %v202_v28  ;;  %1071 = vrcp.f32 %v155_v38 }
  0x4c   : > { %1073 = vrcp.f32 %v156_v40 }
  0x4d   : > { %964 = vmatprep.subr.mxu0 %v1318_v29  ;;  %940 = vmatprep.subr.mxu1 %v1318_v29  ;;  %v1323_v31 = vsub.f32 %v202_v28, %v1318_v29 }
  0x4e   : > { %965 = vmatpush3.msra.mxu0 %v1318_v29  ;;  %941 = vmatpush3.msra.mxu1 %v1318_v29 }
  0x4f   : > { %v325_v36 = vand.u32 4294901760, %v1323_v31 }
  0x51   : > { %v326_v39 = vsub.f32 %v1323_v31, %v325_v36  ;;  %972 = vmatprep.subr.mxu0 %v325_v36 }
  0x52   : > { %v1068_v42 = vpop.eup %1067 }
  0x53   : > { %v327_v41 = vand.u32 4294901760, %v326_v39  ;;  %v205_v44 = vsel %vm203_vm12, %v1068_v42, 0 }
  0x54   : > { %v1070_v43 = vpop.eup %1069  ;;  %v282_v46 = vand.u32 4294901760, %v205_v44 }
  0x55   : > { %948 = vmatprep.subr.mxu1 %v327_v41  ;;  %v1072_v45 = vpop.eup %1071  ;;  %v208_v47 = vsel %vm203_vm12, %v1070_v43, 0 }
  0x56   : > { %v1074_v48 = vpop.eup %1073  ;;  %v292_v49 = vand.u32 4294901760, %v208_v47  ;;  %v211_v50 = vsel %vm203_vm12, %v1072_v45, 0  ;;  %v283_v51 = vsub.f32 %v205_v44, %v282_v46 }
  0x57   : > { %v302_v52 = vand.u32 4294901760, %v211_v50  ;;  %v214_v53 = vsel %vm203_vm12, %v1074_v48, 0 }
  0x58   : > { %v293_v54 = vsub.f32 %v208_v47, %v292_v49  ;;  %v312_v55 = vand.u32 4294901760, %v214_v53  ;;  %v284_v56 = vand.u32 4294901760, %v283_v51 }
  0x59   : > { %v303_v57 = vsub.f32 %v211_v50, %v302_v52 }
  0x5a   : > { %v294_v58 = vand.u32 4294901760, %v293_v54  ;;  %v313_v59 = vsub.f32 %v214_v53, %v312_v55  ;;  %966 = vmatprep.mubr.f32.mxu0 %v284_v56  ;;  %v285_v60 = vsub.f32 %v283_v51, %v284_v56 }
  0x5b   : > { %v304_v61 = vand.u32 4294901760, %v303_v57 }
  0x5c   : > { %967 = vmatmul.mubr.f32.vlgmr.msra.gmra.mrb[0].mxu0 %v294_v58  ;;  %v295_v62 = vsub.f32 %v293_v54, %v294_v58  ;;  %v314_v63 = vand.u32 4294901760, %v313_v59  ;;  %v286_v0 = vand.u32 4294901760, %v285_v60 }
  0x5d   : > { %969 = vmatprep.mubr.f32.mxu0 %v304_v61  ;;  %973 = vmatpush3.msra.mxu0 %v325_v36  ;;  %v305_v1 = vsub.f32 %v303_v57, %v304_v61 }
  0x5e   : > { %v296_v2 = vand.u32 4294901760, %v295_v62  ;;  %v315_v3 = vsub.f32 %v313_v59, %v314_v63  ;;  %980 = vmatprep.subr.mxu0 %v1318_v29  ;;  %942 = vmatprep.mubr.f32.mxu1 %v286_v0 }
  0x5f   : > { %v306_v4 = vand.u32 4294901760, %v305_v1 }
  0x60   : > { %943 = vmatmul.mubr.f32.vlgmr.msra.gmra.mrb[0].mxu1 %v296_v2  ;;  %970 = vmatmul.mubr.f32.gmra.mrb[2].mxu0 %v314_v63  ;;  %v316_v5 = vand.u32 4294901760, %v315_v3 }
  0x61   : > { %949 = vmatpush3.msra.mxu1 %v327_v41  ;;  %945 = vmatprep.mubr.f32.mxu1 %v306_v4 }
  0x62   : > { %974 = vmatprep.mubr.f32.mxu0 %v282_v46  ;;  %956 = vmatprep.subr.mxu1 %v1323_v31 }
  0x64   : > { %946 = vmatmul.mubr.f32.gmra.mrb[2].mxu1 %v316_v5  ;;  %975 = vmatmul.mubr.f32.vlgmr.msra.gmra.mrb[0].mxu0 %v292_v49 }
  0x65   : > { %950 = vmatprep.mubr.f32.mxu1 %v282_v46  ;;  %977 = vmatprep.mubr.f32.mxu0 %v302_v52 }
  0x66   : > { %981 = vmatpush3.msra.mxu0 %v1318_v29 }
  0x68   : > { %951 = vmatmul.mubr.f32.vlgmr.msra.gmra.mrb[0].mxu1 %v292_v49  ;;  %978 = vmatmul.mubr.f32.gmra.mrb[2].mxu0 %v312_v55 }
  0x69   : > { %957 = vmatpush3.msra.mxu1 %v1323_v31  ;;  %953 = vmatprep.mubr.f32.mxu1 %v302_v52 }
  0x6a   : > { %982 = vmatprep.mubr.f32.mxu0 %v282_v46 }
  0x6c   : > { %954 = vmatmul.mubr.f32.gmra.mrb[2].mxu1 %v312_v55  ;;  %983 = vmatmul.mubr.f32.vlgmr.msra.gmra.mrb[0].mxu0 %v292_v49 }
  0x6d   : > { %958 = vmatprep.mubr.f32.mxu1 %v283_v51  ;;  %985 = vmatprep.mubr.f32.mxu0 %v302_v52 }
  0x70   : > { %959 = vmatmul.mubr.f32.vlgmr.msra.gmra.mrb[0].mxu1 %v293_v54  ;;  %986 = vmatmul.mubr.f32.gmra.mrb[2].mxu0 %v312_v55 }
  0x71   : > { %961 = vmatprep.mubr.f32.mxu1 %v303_v57 }
  0x74   : > { %962 = vmatmul.mubr.f32.gmra.mrb[2].mxu1 %v313_v59 }
 0x13f   : > { %v984_v6 = vpop.f32.mrb[0].mxu0 }
 0x140   : > { %v769_v7 = vpop.f32.mrb[1].mxu0 }
 0x143   : > { %v960_v8 = vpop.f32.mrb[0].mxu1  ;;  %v987_v9 = vpop.f32.mrb[2].mxu0 }
 0x144   : > { %v988_v12 = vadd.f32 %v984_v6, %v960_v8  ;;  %v486_v13 = vpop.f32.mrb[1].mxu1  ;;  %v781_v14 = vpop.f32.mrb[3].mxu0 }
 0x145   : > { %v989_v17 = vadd.f32 %v769_v7, %v486_v13 }
 0x146   : > { %v792_v18 = vmul.f32 %v988_v12, %v1306_v11 }
 0x147   : > { %v791_v19 = vmul.f32 %v989_v17, %v1304_v10  ;;  %v963_v20 = vpop.f32.mrb[2].mxu1 }
 0x148   : > { %796 = vst [vmem:[%s134_s17 + $0x8] sm:$0xff] %v792_v18  ;;  %v990_v21 = vadd.f32 %v987_v9, %v963_v20  ;;  %v500_v22 = vpop.f32.mrb[3].mxu1 }
 0x149   : > { %795 = vst [vmem:[%s134_s17] sm:$0xff] %v791_v19  ;;  %v991_v23 = vadd.f32 %v781_v14, %v500_v22 }
 0x14a   : > { %v794_v11 = vmul.f32 %v990_v21, %v1310_v16 }
 0x14b   : > { %v793_v10 = vmul.f32 %v991_v23, %v1308_v15 }
 0x14c   : > { %798 = vst [vmem:[%s134_s17 + $0x18] sm:$0xff] %v794_v11 }
 0x14d   : > { %797 = vst [vmem:[%s134_s17 + $0x10] sm:$0xff] %v793_v10 }
 0x14e   : > { %1118 = shalt.err (!%p1115_p2)
}
 0x14f   : > { %s1119_s13 = scalar_lea.hbm %s1344_s2, 512  ;;  %s1123_s20 = scalar_lea.hbm %s1390_s1, 1024 }
 0x150   : > { %p1120_p4 = scmp.ne.s32.totalorder %s1344_s2, %s1119_s13  ;;  %p1124_p9 = scmp.lt.u32.totalorder %s1344_s2, %s1390_s1 }
 0x151   : > { %p1125_p1 = scmp.lt.u32.totalorder %s1123_s20, %s1119_s13  ;;  %p1127_p6 = scmp.lt.u32.totalorder %s1119_s13, %s1344_s2 }
 0x152   : > { %p1121_p5 = pnand %p1120_p4, %p1397_p11 }
 0x153   : > { %p1126_p3 = por %p1125_p1, %p1124_p9 }
 0x154   : > { %p1122_p7 = pneg %p1121_p5 }
 0x155   : > { %p1128_p12 = por %p1127_p6, %p1126_p3 }
 0x157   : > { %p1129_p13 = pnand %p1128_p12, %p1122_p7 }
 0x159   : > { %1132 = shalt.err (!%p1129_p13)
}
 0x15a   : > { %s1178_s24 = smov 128   ;;  %s1179_s26 = smov 8  }
 0x15b   : > { %1010 = dma.vmem_to_hbm [thread:$0]  (%p1397_p11), %s1338_s25, 512, %s1344_s2, %s800_s10, %s1178_s24, %s1178_s24, %s1179_s26  }
 0x15c PF: > { %s828_s30 = sand.u32 1, %s1159_s6   ;;  %p1398_p8 = scmp.ne.s32.totalorder %s1395_s19, 0 }
 0x15d   : > { %p1399_p10 = scmp.ge.s32.totalorder %s1171_s9, 2  ;;  %s829_s17 = scalar_lea.sflag [#allocation4], %s828_s30 }
 0x15f   : > { %p1017_p0 = pnand %p1399_p10, %p1398_p8 }
 0x161   : > { %1154 = dma.done.wait (!%p1017_p0), %s829_s17, 512  }
 0x162   : > { %1156 = vsyncadd (!%p1017_p0), %s829_s17, 4294966784  ;;  %p14_p2 = scmp.ge.s32.totalorder %s1215_s12, 4   ;;  %s1400_s6 = smov %s1163_s7 }
 0x163   : > { %s1401_s7 = smov %s1167_s8  ;;  %s1402_s8 = smov %s1227_s15 }
 0x164   : > { %s1403_s9 = smov %s1215_s12  ;;  %16 = sbr.rel (!%p14_p2) target bundleno = 5 (0x5), region = 69 }
 0x16b   :  { %834 = vsyncpa [#allocation3], 1 }
 0x16c   :  { %836 = vsyncpa [#allocation3 + $0x1], 1 }
 0x16d   :  { %837 = vsyncpa [#allocation4], 1 }
 0x16e   :  { %839 = vsyncpa [#allocation4 + $0x1], 1 }

</bundles_post_ra>
